<compile_context>
chip_gen: v6e
topology: v6e:2x2x1
jax: 0.10.0
libtpu: 0.0.40
codegen_flags: <defaults>
</compile_context>

<pallas_src>
import numpy as np
import jax
import jax.numpy as jnp
from jax.experimental import pallas as pl
from jax.experimental.pallas import tpu as pltpu  # noqa: F401 (TPU target)

EPS = 1e-5
H = W = 4          # forced by p1 (1,1,1,4), rearrange h=4, Linear(4,10)
P = H * W          # 16 spatial positions

# ---- packed-slab row offsets (all multiples of 8) --------------------------
# slab256 : 256-lane slab (dense conv matrices + their bias rows)
RA1, RA23, RA4, RA51, RA52 = 0, 48, 176, 432, 688
RB1, RB23, RB4, RB51, RB52 = 944, 952, 960, 968, 976
S256_ROWS, S256_COLS = 984, 256
# slab16  : 16-lane slab (fcp∘conv6 matrices, conv6 bias, pooled-fc tail)
RA61, RA62, RB6, RG, RBFC = 0, 256, 512, 520, 536
S16_ROWS, S16_COLS = 544, 16


# ---------------------------------------------------------------------------
# Single fused Pallas kernel: 8 matmuls on flat (B, 16*C) activations.
# ---------------------------------------------------------------------------
def _fused_kernel(x_ref, w_ref, t_ref, o_ref):
  dot = lambda a, b: jnp.dot(a, b, preferred_element_type=jnp.float32)
  x = x_ref[...]                                                     # (B, 48)

  # conv1 (+bn1, +p1)                                                 (B, 128)
  h1 = dot(x, w_ref[RA1:RA1 + 48, 0:128]) + w_ref[RB1:RB1 + 1, 0:128]
  # chunk -> conv2|conv3 -> cat -> bn23 (block-diagonal dense conv)   (B, 256)
  h2 = dot(h1, w_ref[RA23:RA23 + 128, :]) + w_ref[RB23:RB23 + 1, :]
  # branch 1: depthwise conv4 (+bn4, +bn45[:16])                      (B, 256)
  xb1 = dot(h2, w_ref[RA4:RA4 + 256, :]) + w_ref[RB4:RB4 + 1, :]
  # branch 2: conv5_1, then conv5_2 on (y51 + identity) (+bn5i,+bn45[16:])
  y51 = dot(h2, w_ref[RA51:RA51 + 256, :]) + w_ref[RB51:RB51 + 1, :]
  y52 = dot(y51 + h2, w_ref[RA52:RA52 + 256, :]) + w_ref[RB52:RB52 + 1, :]
  # fcp composed into conv6 (+bn6); concat never materialized         (B, 16)
  y6 = (dot(xb1, t_ref[RA61:RA61 + 256, :])
        + dot(y52, t_ref[RA62:RA62 + 256, :])
        + t_ref[RB6:RB6 + 1, :])
  # relu -> *p6 -> 2x2 avg-pool -> flatten -> fc  ==  relu(y6) @ G + bfc
  a = jnp.maximum(y6, 0.0)
  out16 = dot(a, t_ref[RG:RG + 16, :]) + t_ref[RBFC:RBFC + 1, :]     # (B, 16)
  o_ref[...] = out16[:, 0:10]


def fused_forward(x_flat, slab256, slab16):
  B = x_flat.shape[0]
  return pl.pallas_call(
      _fused_kernel,
      out_shape=jax.ShapeDtypeStruct((B, 10), jnp.float32),
  )(x_flat, slab256, slab16)


def model_forward(x_nchw, slab256, slab16):
  # NCHW -> NHWC -> flat (B, 16*3) with index (h*4+w)*3 + c (lane dim last).
  B = x_nchw.shape[0]
  x = jnp.transpose(x_nchw, (0, 2, 3, 1)).astype(jnp.float32).reshape(B, P * 3)
  return fused_forward(x, slab256, slab16)


# ---------------------------------------------------------------------------
# Parameters (deterministic, synthetic) -- unchanged from previous version.
# ---------------------------------------------------------------------------
def init_params(key):
  ks = jax.random.split(key, 18)

  def conv_w(k, cin, cout):
    kw, kb = jax.random.split(k)
    w = jax.random.normal(kw, (3, 3, cin, cout), jnp.float32) / np.sqrt(9 * cin)
    b = 0.05 * jax.random.normal(kb, (cout,), jnp.float32)
    return w.reshape(9, cin, cout), b

  def bn(k, c):
    k1, k2, k3, k4 = jax.random.split(k, 4)
    gamma = jax.random.uniform(k1, (c,), jnp.float32, 0.5, 1.5)
    beta = 0.1 * jax.random.normal(k2, (c,), jnp.float32)
    mean = 0.1 * jax.random.normal(k3, (c,), jnp.float32)
    var = jax.random.uniform(k4, (c,), jnp.float32, 0.5, 1.5)
    scale = gamma / jnp.sqrt(var + EPS)
    shift = beta - mean * scale
    return scale, shift

  p = {}
  p['w1'], p['b1'] = conv_w(ks[0], 3, 8)
  p['bn1'] = bn(ks[1], 8)
  p['p1'] = jax.random.normal(ks[2], (4,), jnp.float32)      # torch (1,1,1,4)
  p['w2'], p['b2'] = conv_w(ks[3], 4, 8)
  p['w3'], p['b3'] = conv_w(ks[4], 4, 8)
  p['bn23'] = bn(ks[5], 16)
  kdw, kdb = jax.random.split(ks[6])
  p['w4'] = jax.random.normal(kdw, (9, 16), jnp.float32) / 3.0   # depthwise
  p['b4'] = 0.05 * jax.random.normal(kdb, (16,), jnp.float32)
  p['bn4'] = bn(ks[7], 16)
  p['w51'], p['b51'] = conv_w(ks[8], 16, 16)
  p['w52'], p['b52'] = conv_w(ks[9], 16, 16)
  p['bn5i'] = bn(ks[10], 16)
  p['bn45'] = bn(ks[11], 32)
  kfw, kfb = jax.random.split(ks[12])
  p['wfcp'] = jax.random.normal(kfw, (32, 32), jnp.float32) / np.sqrt(32)
  p['bfcp'] = 0.05 * jax.random.normal(kfb, (32,), jnp.float32)
  p['w6'], p['b6'] = conv_w(ks[13], 32, 1)
  p['bn6'] = bn(ks[14], 1)
  p['p6'] = jax.random.normal(ks[15], (1, 1), jnp.float32)   # torch (1,1,1,1)
  kgw, kgb = jax.random.split(ks[16])
  p['wfc'] = jax.random.normal(kgw, (4, 10), jnp.float32) / 2.0
  p['bfc'] = 0.05 * jax.random.normal(kgb, (10,), jnp.float32)
  return p


# ---------------------------------------------------------------------------
# One-time host-side preparation: dense conv matrices + BN folding + packing.
# ---------------------------------------------------------------------------
def _conv_mat(w9, cin, cout):
  """Dense matrix of a 3x3 stride-1 'same' conv on the fixed 4x4 grid.

  w9: (9, cin, cout).  y_flat = x_flat @ A, with flat index (h*4+w)*c + ch;
  the zero 'same' padding is baked into A (border taps simply contribute 0).
  """
  w9 = np.asarray(w9, np.float32)
  A = np.zeros((P * cin, P * cout), np.float32)
  for ho in range(H):
    for wo in range(W):
      po = ho * W + wo
      for dy in range(3):
        for dx in range(3):
          hi, wi = ho + dy - 1, wo + dx - 1
          if 0 <= hi < H and 0 <= wi < W:
            pi = hi * W + wi
            A[pi * cin:(pi + 1) * cin, po * cout:(po + 1) * cout] += w9[dy * 3 + dx]
  return A


def _dwconv_mat(w9, c):
  """Dense matrix of the depthwise (groups == c) 3x3 'same' conv."""
  w9 = np.asarray(w9, np.float32)
  A = np.zeros((P * c, P * c), np.float32)
  idx = np.arange(c)
  for ho in range(H):
    for wo in range(W):
      po = ho * W + wo
      for dy in range(3):
        for dx in range(3):
          hi, wi = ho + dy - 1, wo + dx - 1
          if 0 <= hi < H and 0 <= wi < W:
            pi = hi * W + wi
            A[pi * c + idx, po * c + idx] += w9[dy * 3 + dx]
  return A


def _per_pos(b):
  """(c,) per-channel bias -> (16*c,) per-(position, channel) bias row."""
  return np.tile(np.asarray(b, np.float32), P)


def prepare_params(p):
  f = lambda a: np.asarray(a, np.float32)
  s1, t1 = map(f, p['bn1']); s23, t23 = map(f, p['bn23'])
  s4, t4 = map(f, p['bn4']); s5i, t5i = map(f, p['bn5i'])
  s45, t45 = map(f, p['bn45']); s6, t6 = map(f, p['bn6'])

  s256 = np.zeros((S256_ROWS, S256_COLS), np.float32)
  s16 = np.zeros((S16_ROWS, S16_COLS), np.float32)

  # conv1 (+bn1 folded); p1 (broadcast over W) folded into the bias row.
  s256[RA1:RA1 + 48, 0:128] = _conv_mat(f(p['w1']) * s1[None, None, :], 3, 8)
  b1 = _per_pos(f(p['b1']) * s1 + t1) + np.repeat(np.tile(f(p['p1']), H), 8)
  s256[RB1, 0:128] = b1

  # chunk -> conv2|conv3 -> cat -> bn23 : one block-diagonal dense conv.
  w23 = np.zeros((9, 8, 16), np.float32)
  w23[:, :4, :8] = f(p['w2']); w23[:, 4:, 8:] = f(p['w3'])
  b23 = np.concatenate([f(p['b2']), f(p['b3'])])
  s256[RA23:RA23 + 128, :] = _conv_mat(w23 * s23[None, None, :], 8, 16)
  s256[RB23, :] = _per_pos(b23 * s23 + t23)

  # depthwise conv4 (+bn4 and bn45[:16] composed).
  s4e = s4 * s45[:16]; t4e = t4 * s45[:16] + t45[:16]
  s256[RA4:RA4 + 256, :] = _dwconv_mat(f(p['w4']) * s4e[None, :], 16)
  s256[RB4, :] = _per_pos(f(p['b4']) * s4e + t4e)

  # conv5_1 (no BN here).
  s256[RA51:RA51 + 256, :] = _conv_mat(f(p['w51']), 16, 16)
  s256[RB51, :] = _per_pos(f(p['b51']))

  # conv5_2 (+bn5i and bn45[16:] composed).
  s52e = s5i * s45[16:]; t52e = t5i * s45[16:] + t45[16:]
  s256[RA52:RA52 + 256, :] = _conv_mat(f(p['w52']) * s52e[None, None, :], 16, 16)
  s256[RB52, :] = _per_pos(f(p['b52']) * s52e + t52e)

  # fcp (1x1 linear) composed into conv6 (+bn6), split into xb1/y52 halves so
  # the channel concat never exists.  bfcp's position-dependent contribution
  # through conv6's zero padding is pre-convolved into the bias (exactly,
  # via the dense conv6 matrix).
  Wfcp, bfcp = f(p['wfcp']), f(p['bfcp'])
  F1 = np.zeros((P * 16, P * 32), np.float32)
  F2 = np.zeros((P * 16, P * 32), np.float32)
  for pos in range(P):
    F1[pos * 16:(pos + 1) * 16, pos * 32:(pos + 1) * 32] = Wfcp[:16, :]
    F2[pos * 16:(pos + 1) * 16, pos * 32:(pos + 1) * 32] = Wfcp[16:, :]
  A6 = _conv_mat(f(p['w6']), 32, 1)                              # (512, 16)
  s6s, t6s = float(s6[0]), float(t6[0])
  s16[RA61:RA61 + 256, :] = (F1 @ A6) * s6s
  s16[RA62:RA62 + 256, :] = (F2 @ A6) * s6s
  s16[RB6, :] = (np.tile(bfcp, P) @ A6 + float(f(p['b6'])[0])) * s6s + t6s

  # Tail: relu -> *p6 -> 2x2 avg-pool -> flatten -> fc == relu(y6) @ G + bfc,
  # with p6 folded into G.
  p6 = float(f(p['p6'])[0, 0])
  jmap = np.array([(h // 2) * 2 + (w // 2) for h in range(H) for w in range(W)],
                  np.int32)
  s16[RG:RG + 16, 0:10] = 0.25 * p6 * f(p['wfc'])[jmap, :]
  s16[RBFC, 0:10] = f(p['bfc'])

  return jnp.asarray(s256), jnp.asarray(s16)


# ---------------------------------------------------------------------------
# Pure-JAX layer-by-layer reference (for validation).
# ---------------------------------------------------------------------------
def _conv_ref(x, w9, b, scale, shift, post):
  cin, cout = w9.shape[1], w9.shape[2]
  w = w9.reshape(3, 3, cin, cout)
  y = jax.lax.conv_general_dilated(
      x, w, (1, 1), ((1, 1), (1, 1)),
      dimension_numbers=('NHWC', 'HWIO', 'NHWC'),
      precision=jax.lax.Precision.HIGHEST)
  return (y + b) * scale + shift + post


def _dwconv_ref(x, w9, b, scale, shift):
  c = x.shape[-1]
  w = w9.reshape(3, 3, 1, c)
  y = jax.lax.conv_general_dilated(
      x, w, (1, 1), ((1, 1), (1, 1)),
      dimension_numbers=('NHWC', 'HWIO', 'NHWC'),
      feature_group_count=c, precision=jax.lax.Precision.HIGHEST)
  return (y + b) * scale + shift


def reference_forward(x_nchw, p):
  x = jnp.transpose(x_nchw, (0, 2, 3, 1)).astype(jnp.float32)
  B = x.shape[0]
  row = lambda v: v.reshape(1, -1)
  chn = lambda v: v.reshape(1, 1, -1)
  s1, t1 = p['bn1']; s23, t23 = p['bn23']; s4, t4 = p['bn4']
  s5i, t5i = p['bn5i']; s45, t45 = p['bn45']; s6, t6 = p['bn6']
  s4e, t4e = s4 * s45[:16], t4 * s45[:16] + t45[:16]
  s52e, t52e = s5i * s45[16:], t5i * s45[16:] + t45[16:]
  post1 = jnp.broadcast_to(p['p1'].reshape(1, W, 1), (H, W, 8))
  z8 = jnp.zeros((H, W, 8), jnp.float32)
  z16 = jnp.zeros((H, W, 16), jnp.float32)
  z1 = jnp.zeros((H, W, 1), jnp.float32)
  y = _conv_ref(x, p['w1'], row(p['b1']), row(s1), row(t1), post1)
  x1, x2 = y[..., :4], y[..., 4:]
  y2 = _conv_ref(x1, p['w2'], row(p['b2']), row(s23[:8]), row(t23[:8]), z8)
  y3 = _conv_ref(x2, p['w3'], row(p['b3']), row(s23[8:]), row(t23[8:]), z8)
  xc = jnp.concatenate([y2, y3], axis=-1)
  xb1 = _dwconv_ref(xc, p['w4'], chn(p['b4']), chn(s4e), chn(t4e))
  y51 = _conv_ref(xc, p['w51'], row(p['b51']),
                  row(jnp.ones(16, jnp.float32)),
                  row(jnp.zeros(16, jnp.float32)), z16)
  y52 = _conv_ref(y51 + xc, p['w52'], row(p['b52']), row(s52e), row(t52e), z16)
  xcat = jnp.concatenate([xb1, y52], axis=-1)
  xf = xcat.reshape(B * H * W, 32)
  yf = (jnp.dot(xf, p['wfcp'], precision='highest')
        + p['bfcp']).reshape(B, H, W, 32)
  y6 = _conv_ref(yf, p['w6'], row(p['b6']), row(s6), row(t6), z1)
  a = jnp.maximum(y6[..., 0], 0.0) * p['p6'][0, 0]
  pooled = a.reshape(B, 2, 2, 2, 2).mean(axis=(2, 4)).reshape(B, 4)
  return jnp.dot(pooled, p['wfc'], precision='highest') + p['bfc']


if __name__ == "__main__":
  key = jax.random.PRNGKey(0)
  kparam, kx = jax.random.split(key)
  params = init_params(kparam)
  x = jax.random.normal(kx, (2, 3, 4, 4), jnp.float32)   # NCHW, like PyTorch

  slab256, slab16 = prepare_params(params)
  out = jax.block_until_ready(jax.jit(model_forward)(x, slab256, slab16))
  ref = jax.block_until_ready(reference_forward(x, params))

  assert out.shape == (2, 10) and out.dtype == jnp.float32
  assert bool(jnp.all(jnp.isfinite(out)))
  err = float(np.max(np.abs(np.asarray(out) - np.asarray(ref))))
  assert np.allclose(np.asarray(out), np.asarray(ref), atol=1e-2, rtol=1e-2), (
      "max abs err = %g" % err)
  print("KERNEL_OK")
</pallas_src>

<mosaic_0001>
module attributes {stable_mosaic.version = 11 : i64} {
  func.func @_fused_kernel(%arg0: memref<2x48xf32, #tpu.memory_space<vmem>>, %arg1: memref<984x256xf32, #tpu.memory_space<vmem>>, %arg2: memref<544x16xf32, #tpu.memory_space<vmem>>, %arg3: memref<2x10xf32, #tpu.memory_space<vmem>>) attributes {dimension_semantics = [], scalar_prefetch = 0 : i64, scratch_operands = 0 : i64, tpu.core_type = #tpu.core_type<tc>} {
    %c0 = arith.constant 0 : index
    %c0_0 = arith.constant 0 : index
    %0 = vector.load %arg0[%c0, %c0_0] : memref<2x48xf32, #tpu.memory_space<vmem>>, vector<2x48xf32>
    %c0_1 = arith.constant 0 : index
    %c0_2 = arith.constant 0 : index
    %1 = vector.load %arg1[%c0_1, %c0_2] : memref<984x256xf32, #tpu.memory_space<vmem>>, vector<48x128xf32>
    %cst = arith.constant dense<0.000000e+00> : vector<2x128xf32>
    %2 = tpu.matmul %0, %1, %cst {dimension_numbers = #tpu.dot_dimension_numbers<[1], [0], [0], [1], [0, 0, 1, 1], [], []>} : vector<2x48xf32>, vector<48x128xf32>, vector<2x128xf32> -> vector<2x128xf32>
    %c944 = arith.constant 944 : index
    %c0_3 = arith.constant 0 : index
    %3 = vector.load %arg1[%c944, %c0_3] : memref<984x256xf32, #tpu.memory_space<vmem>>, vector<1x128xf32>
    %4 = vector.broadcast %3 : vector<1x128xf32> to vector<2x128xf32>
    %5 = arith.addf %2, %4 : vector<2x128xf32>
    %c48 = arith.constant 48 : index
    %c0_4 = arith.constant 0 : index
    %6 = vector.load %arg1[%c48, %c0_4] : memref<984x256xf32, #tpu.memory_space<vmem>>, vector<128x256xf32>
    %cst_5 = arith.constant dense<0.000000e+00> : vector<2x256xf32>
    %7 = tpu.matmul %5, %6, %cst_5 {dimension_numbers = #tpu.dot_dimension_numbers<[1], [0], [0], [1], [0, 0, 1, 1], [], []>} : vector<2x128xf32>, vector<128x256xf32>, vector<2x256xf32> -> vector<2x256xf32>
    %c952 = arith.constant 952 : index
    %c0_6 = arith.constant 0 : index
    %8 = vector.load %arg1[%c952, %c0_6] : memref<984x256xf32, #tpu.memory_space<vmem>>, vector<1x256xf32>
    %9 = vector.broadcast %8 : vector<1x256xf32> to vector<2x256xf32>
    %10 = arith.addf %7, %9 : vector<2x256xf32>
    %c176 = arith.constant 176 : index
    %c0_7 = arith.constant 0 : index
    %11 = vector.load %arg1[%c176, %c0_7] : memref<984x256xf32, #tpu.memory_space<vmem>>, vector<256x256xf32>
    %cst_8 = arith.constant dense<0.000000e+00> : vector<2x256xf32>
    %12 = tpu.matmul %10, %11, %cst_8 {dimension_numbers = #tpu.dot_dimension_numbers<[1], [0], [0], [1], [0, 0, 1, 1], [], []>} : vector<2x256xf32>, vector<256x256xf32>, vector<2x256xf32> -> vector<2x256xf32>
    %c960 = arith.constant 960 : index
    %c0_9 = arith.constant 0 : index
    %13 = vector.load %arg1[%c960, %c0_9] : memref<984x256xf32, #tpu.memory_space<vmem>>, vector<1x256xf32>
    %14 = vector.broadcast %13 : vector<1x256xf32> to vector<2x256xf32>
    %15 = arith.addf %12, %14 : vector<2x256xf32>
    %c432 = arith.constant 432 : index
    %c0_10 = arith.constant 0 : index
    %16 = vector.load %arg1[%c432, %c0_10] : memref<984x256xf32, #tpu.memory_space<vmem>>, vector<256x256xf32>
    %cst_11 = arith.constant dense<0.000000e+00> : vector<2x256xf32>
    %17 = tpu.matmul %10, %16, %cst_11 {dimension_numbers = #tpu.dot_dimension_numbers<[1], [0], [0], [1], [0, 0, 1, 1], [], []>} : vector<2x256xf32>, vector<256x256xf32>, vector<2x256xf32> -> vector<2x256xf32>
    %c968 = arith.constant 968 : index
    %c0_12 = arith.constant 0 : index
    %18 = vector.load %arg1[%c968, %c0_12] : memref<984x256xf32, #tpu.memory_space<vmem>>, vector<1x256xf32>
    %19 = vector.broadcast %18 : vector<1x256xf32> to vector<2x256xf32>
    %20 = arith.addf %17, %19 : vector<2x256xf32>
    %21 = arith.addf %20, %10 : vector<2x256xf32>
    %c688 = arith.constant 688 : index
    %c0_13 = arith.constant 0 : index
    %22 = vector.load %arg1[%c688, %c0_13] : memref<984x256xf32, #tpu.memory_space<vmem>>, vector<256x256xf32>
    %cst_14 = arith.constant dense<0.000000e+00> : vector<2x256xf32>
    %23 = tpu.matmul %21, %22, %cst_14 {dimension_numbers = #tpu.dot_dimension_numbers<[1], [0], [0], [1], [0, 0, 1, 1], [], []>} : vector<2x256xf32>, vector<256x256xf32>, vector<2x256xf32> -> vector<2x256xf32>
    %c976 = arith.constant 976 : index
    %c0_15 = arith.constant 0 : index
    %24 = vector.load %arg1[%c976, %c0_15] : memref<984x256xf32, #tpu.memory_space<vmem>>, vector<1x256xf32>
    %25 = vector.broadcast %24 : vector<1x256xf32> to vector<2x256xf32>
    %26 = arith.addf %23, %25 : vector<2x256xf32>
    %c0_16 = arith.constant 0 : index
    %c0_17 = arith.constant 0 : index
    %27 = vector.load %arg2[%c0_16, %c0_17] : memref<544x16xf32, #tpu.memory_space<vmem>>, vector<256x16xf32>
    %cst_18 = arith.constant dense<0.000000e+00> : vector<2x16xf32>
    %28 = tpu.matmul %15, %27, %cst_18 {dimension_numbers = #tpu.dot_dimension_numbers<[1], [0], [0], [1], [0, 0, 1, 1], [], []>} : vector<2x256xf32>, vector<256x16xf32>, vector<2x16xf32> -> vector<2x16xf32>
    %c256 = arith.constant 256 : index
    %c0_19 = arith.constant 0 : index
    %29 = vector.load %arg2[%c256, %c0_19] : memref<544x16xf32, #tpu.memory_space<vmem>>, vector<256x16xf32>
    %cst_20 = arith.constant dense<0.000000e+00> : vector<2x16xf32>
    %30 = tpu.matmul %26, %29, %cst_20 {dimension_numbers = #tpu.dot_dimension_numbers<[1], [0], [0], [1], [0, 0, 1, 1], [], []>} : vector<2x256xf32>, vector<256x16xf32>, vector<2x16xf32> -> vector<2x16xf32>
    %31 = arith.addf %28, %30 : vector<2x16xf32>
    %c512 = arith.constant 512 : index
    %c0_21 = arith.constant 0 : index
    %32 = vector.load %arg2[%c512, %c0_21] : memref<544x16xf32, #tpu.memory_space<vmem>>, vector<1x16xf32>
    %33 = vector.broadcast %32 : vector<1x16xf32> to vector<2x16xf32>
    %34 = arith.addf %31, %33 : vector<2x16xf32>
    %cst_22 = arith.constant 0.000000e+00 : f32
    %35 = vector.broadcast %cst_22 : f32 to vector<2x16xf32>
    %36 = arith.maximumf %34, %35 : vector<2x16xf32>
    %c520 = arith.constant 520 : index
    %c0_23 = arith.constant 0 : index
    %37 = vector.load %arg2[%c520, %c0_23] : memref<544x16xf32, #tpu.memory_space<vmem>>, vector<16x16xf32>
    %cst_24 = arith.constant dense<0.000000e+00> : vector<2x16xf32>
    %38 = tpu.matmul %36, %37, %cst_24 {dimension_numbers = #tpu.dot_dimension_numbers<[1], [0], [0], [1], [0, 0, 1, 1], [], []>} : vector<2x16xf32>, vector<16x16xf32>, vector<2x16xf32> -> vector<2x16xf32>
    %c536 = arith.constant 536 : index
    %c0_25 = arith.constant 0 : index
    %39 = vector.load %arg2[%c536, %c0_25] : memref<544x16xf32, #tpu.memory_space<vmem>>, vector<1x16xf32>
    %40 = vector.broadcast %39 : vector<1x16xf32> to vector<2x16xf32>
    %41 = arith.addf %38, %40 : vector<2x16xf32>
    %42 = vector.extract_strided_slice %41 {offsets = [0, 0], sizes = [2, 10], strides = [1, 1]} : vector<2x16xf32> to vector<2x10xf32>
    %c0_26 = arith.constant 0 : index
    %c0_27 = arith.constant 0 : index
    %43 = vector.load %arg3[%c0_26, %c0_27] : memref<2x10xf32, #tpu.memory_space<vmem>>, vector<2x10xf32>
    tpu.vector_store %arg3[%c0_26, %c0_27], %42 {strides = array<i32>} : memref<2x10xf32, #tpu.memory_space<vmem>>, vector<2x10xf32>,
    return
  }
}

</mosaic_0001>

<bundles_post_ra>
// kernel: model_forward.1
= control target key start
LH: loop header
LB: loop body
LE: loop exit
PB: predicated region body
PF: predicated region fallthrough
CT: control target
= control target key end

     0   :  { %8 = vsyncpa [#allocation3], 0  ;;  %s1419_s0 = inlined_call_operand.vmem [shape: f32[2,48], index: 0, kind: input, shape index: {}]   ;;  %s1420_s1 = inlined_call_operand.hbm [shape: f32[984,256], index: 1, kind: input, shape index: {}]   ;;  %s1421_s2 = inlined_call_operand.vmem [shape: f32[544,16], index: 2, kind: input, shape index: {}]   ;;  %s1422_s3 = inlined_call_operand.hbm [shape: f32[2,10], index: 3, kind: output, shape index: {}]  }
   0x1   :  { %9 = vsyncpa [#allocation4], 0  ;;  %s1138_s12 = smov [#allocation2]  }
   0x2   :  { %s17_s13 = sshll.u32 %s1138_s12, 4  ;;  %s18_s13 = int_to_ptr.vmem [resolvable:$true] %s17_s13 }
   0x3   :  { %s1102_s14 = scalar_lea.vmem %s18_s13, 31488  ;;  %p1107_p1 = scmp.lt.s32.totalorder %s18_s13, %s18_s13 }
   0x4   :  { %p1103_p0 = scmp.ne.s32.totalorder %s18_s13, %s1102_s14  ;;  %p1108_p2 = scmp.lt.s32.totalorder %s1102_s14, %s1102_s14 }
   0x6   :  { %p1109_p3 = por %p1108_p2, %p1107_p1 }
   0x8   :  { %p1110_p4 = pnand %p1109_p3, %p1103_p0 }
   0xa   :  { %1113 = shalt.err (!%p1110_p4)
}
   0xb   :  { %s1139_s15 = smov 256   ;;  %s1140_s16 = smov 16  }
   0xc   :  { %23 = dma.hbm_to_vmem [thread:$0]  %s1420_s1, 31488, %s18_s13, [#allocation3], %s1139_s15, %s1139_s15, %s1140_s16  }
   0xd   :  { %1134 = dma.done.wait [#allocation3], 31488  }
   0xe   :  { %1135 = vsyncadd [#allocation3], 4294935808  ;;  %v1141_v0 = vmov 0.0   ;;  %vm1142_vm0 = vmmov 0   ;;  %v35_v1 = vld [vmem:[#allocation2 + $0x50] sm:$0xff]  ;;  %v34_v2 = vld [vmem:[#allocation2 + $0x40] sm:$0xff] }
   0xf   :  { %1066 = vmatprep.subr.mxu0 %v1141_v0  ;;  %1078 = vmatprep.mubr.msk.f32.mxu0 %vm1142_vm0, %v1141_v0  ;;  %v33_v3 = vld [vmem:[#allocation2 + $0x30] sm:$0xff]  ;;  %v142_v4 = vld [vmem:[#allocation2 + $0x158] sm:$0xff]  ;;  %v140_v6 = vld [vmem:[#allocation2 + $0x148] sm:$0xff]  ;;  %vm37_vm1 = vcmask 392192   ;;  %vm891_vm2 = vcmask 130048   ;;  %s1143_s12 = smov [#allocation5]  }
  0x10   :  { %220 = vmatprep.mubr.f32.mxu1 %v1141_v0  ;;  %1067 = vmatpush3.msra.mxu0 %v35_v1  ;;  %v141_v5 = vld [vmem:[#allocation2 + $0x150] sm:$0xff]  ;;  %v139_v7 = vld [vmem:[#allocation2 + $0x140] sm:$0xff]  ;;  %v138_v9 = vld [vmem:[#allocation2 + $0x138] sm:$0xff]  ;;  %s973_s13 = sshll.u32 %s1143_s12, 4  ;;  %vm965_vm3 = vcmask 74752   ;;  %s974_s13 = int_to_ptr.vmem [resolvable:$true] %s973_s13 }
  0x11   :  { %1068 = vmatprep.subr.mxu0 %v1141_v0  ;;  %156 = vmatprep.subr.mxu1 %v142_v4  ;;  %v32_v8 = vld [vmem:[#allocation2 + $0x20] sm:$0xff]  ;;  %v137_v10 = vld [vmem:[#allocation2 + $0x130] sm:$0xff]  ;;  %v136_v12 = vld [vmem:[#allocation2 + $0x128] sm:$0xff]  ;;  %s1114_s14 = scalar_lea.vmem %s974_s13, 32  ;;  %p1119_p6 = scmp.lt.s32.totalorder %s974_s13, %s974_s13 }
  0x12   :  { %1069 = vmatpush3.msra.mxu0 %v34_v2  ;;  %157 = vmatpush1.msra.mxu1 %v141_v5  ;;  %v31_v11 = vld [vmem:[#allocation2 + $0x10] sm:$0xff]  ;;  %v135_v13 = vld [vmem:[#allocation2 + $0x120] sm:$0xff]  ;;  %v134_v15 = vld [vmem:[#allocation2 + $0x118] sm:$0xff]  ;;  %p1115_p5 = scmp.ne.s32.totalorder %s974_s13, %s1114_s14  ;;  %p1120_p7 = scmp.lt.s32.totalorder %s1114_s14, %s1114_s14 }
  0x13   :  { %1070 = vmatprep.subr.mxu0 %v1141_v0  ;;  %158 = vmatprep.subr.mxu1 %v140_v6  ;;  %v30_v14 = vld [vmem:[#allocation2] sm:$0xff]  ;;  %v133_v17 = vld [vmem:[#allocation2 + $0x110] sm:$0xff]  ;;  %v132_v18 = vld [vmem:[#allocation2 + $0x108] sm:$0xff] }
  0x14   :  { %1071 = vmatpush3.msra.mxu0 %v33_v3  ;;  %159 = vmatpush1.msra.mxu1 %v139_v7  ;;  %v29_v16 = vld [vmem:[%s1419_s0] sm:$0x3]  ;;  %v130_v20 = vld [vmem:[#allocation2 + $0xf8] sm:$0xff]  ;;  %v129_v21 = vld [vmem:[#allocation2 + $0xf0] sm:$0xff]  ;;  %p1121_p8 = por %p1120_p7, %p1119_p6 }
  0x15   :  { %1072 = vmatprep.subr.mxu0 %v1141_v0  ;;  %160 = vmatprep.subr.mxu1 %v138_v9  ;;  %v131_v19 = vld [vmem:[#allocation2 + $0x100] sm:$0xff]  ;;  %v128_v22 = vld [vmem:[#allocation2 + $0xe8] sm:$0xff]  ;;  %v126_v24 = vld [vmem:[#allocation2 + $0xd8] sm:$0xff] }
  0x16   :  { %1073 = vmatpush3.msra.mxu0 %v32_v8  ;;  %161 = vmatpush1.msra.mxu1 %v137_v10  ;;  %v127_v23 = vld [vmem:[#allocation2 + $0xe0] sm:$0xff]  ;;  %v125_v25 = vld [vmem:[#allocation2 + $0xd0] sm:$0xff]  ;;  %v124_v26 = vld [vmem:[#allocation2 + $0xc8] sm:$0xff]  ;;  %p1122_p9 = pnand %p1121_p8, %p1115_p5 }
  0x17   :  { %1074 = vmatprep.subr.mxu0 %v1141_v0  ;;  %162 = vmatprep.subr.mxu1 %v136_v12  ;;  %v123_v27 = vld [vmem:[#allocation2 + $0xc0] sm:$0xff]  ;;  %v122_v28 = vld [vmem:[#allocation2 + $0xb8] sm:$0xff]  ;;  %v121_v29 = vld [vmem:[#allocation2 + $0xb0] sm:$0xff] }
  0x18   :  { %1075 = vmatpush3.msra.mxu0 %v31_v11  ;;  %163 = vmatpush1.msra.mxu1 %v135_v13  ;;  %v120_v30 = vld [vmem:[#allocation2 + $0xa8] sm:$0xff]  ;;  %v119_v31 = vld [vmem:[#allocation2 + $0xa0] sm:$0xff]  ;;  %v118_v32 = vld [vmem:[#allocation2 + $0x98] sm:$0xff] }
  0x19   :  { %1076 = vmatprep.subr.mxu0 %v1141_v0  ;;  %164 = vmatprep.subr.mxu1 %v134_v15  ;;  %v117_v33 = vld [vmem:[#allocation2 + $0x90] sm:$0xff]  ;;  %v116_v34 = vld [vmem:[#allocation2 + $0x88] sm:$0xff]  ;;  %v115_v35 = vld [vmem:[#allocation2 + $0x80] sm:$0xff] }
  0x1a   :  { %1077 = vmatpush3.msra.mxu0 %v30_v14  ;;  %165 = vmatpush1.msra.mxu1 %v133_v17  ;;  %v114_v36 = vld [vmem:[#allocation2 + $0x78] sm:$0xff]  ;;  %v113_v37 = vld [vmem:[#allocation2 + $0x70] sm:$0xff]  ;;  %v112_v38 = vld [vmem:[#allocation2 + $0x68] sm:$0xff] }
  0x1b   :  { %1079 = vmatmul.mubr.msk.f32.vlgmr.msra.gmra.mxu0 %vm37_vm1, %v29_v16  ;;  %166 = vmatprep.subr.mxu1 %v132_v18  ;;  %v111_v39 = vld [vmem:[#allocation2 + $0x60] sm:$0xff]  ;;  %v258_v40 = vld [vmem:[#allocation2 + $0x258] sm:$0xff]  ;;  %v257_v42 = vld [vmem:[#allocation2 + $0x250] sm:$0xff] }
  0x1c   :  { %167 = vmatpush1.msra.mxu1 %v131_v19  ;;  %v406_v41 = vld [vmem:[#allocation2 + $0x458] sm:$0xff]  ;;  %304 = vmatprep.subr.mxu0 %v258_v40  ;;  %v256_v43 = vld [vmem:[#allocation2 + $0x248] sm:$0xff]  ;;  %v255_v44 = vld [vmem:[#allocation2 + $0x240] sm:$0xff] }
  0x1d   :  { %168 = vmatprep.subr.mxu1 %v130_v20  ;;  %305 = vmatpush1.msra.mxu0 %v257_v42  ;;  %v254_v45 = vld [vmem:[#allocation2 + $0x238] sm:$0xff]  ;;  %v253_v46 = vld [vmem:[#allocation2 + $0x230] sm:$0xff]  ;;  %v252_v47 = vld [vmem:[#allocation2 + $0x228] sm:$0xff] }
  0x1e   :  { %169 = vmatpush1.msra.mxu1 %v129_v21  ;;  %306 = vmatprep.subr.mxu0 %v256_v43  ;;  %v251_v48 = vld [vmem:[#allocation2 + $0x220] sm:$0xff]  ;;  %v250_v49 = vld [vmem:[#allocation2 + $0x218] sm:$0xff]  ;;  %v249_v50 = vld [vmem:[#allocation2 + $0x210] sm:$0xff] }
  0x1f   :  { %170 = vmatprep.subr.mxu1 %v128_v22  ;;  %307 = vmatpush1.msra.mxu0 %v255_v44  ;;  %v248_v51 = vld [vmem:[#allocation2 + $0x208] sm:$0xff]  ;;  %v247_v52 = vld [vmem:[#allocation2 + $0x200] sm:$0xff]  ;;  %v246_v53 = vld [vmem:[#allocation2 + $0x1f8] sm:$0xff] }
  0x20   :  { %171 = vmatpush1.msra.mxu1 %v127_v23  ;;  %308 = vmatprep.subr.mxu0 %v254_v45  ;;  %v245_v54 = vld [vmem:[#allocation2 + $0x1f0] sm:$0xff]  ;;  %v244_v55 = vld [vmem:[#allocation2 + $0x1e8] sm:$0xff]  ;;  %v243_v56 = vld [vmem:[#allocation2 + $0x1e0] sm:$0xff] }
  0x21   :  { %172 = vmatprep.subr.mxu1 %v126_v24  ;;  %309 = vmatpush1.msra.mxu0 %v253_v46  ;;  %v242_v57 = vld [vmem:[#allocation2 + $0x1d8] sm:$0xff]  ;;  %v241_v58 = vld [vmem:[#allocation2 + $0x1d0] sm:$0xff]  ;;  %v240_v59 = vld [vmem:[#allocation2 + $0x1c8] sm:$0xff] }
  0x22   :  { %173 = vmatpush1.msra.mxu1 %v125_v25  ;;  %310 = vmatprep.subr.mxu0 %v252_v47  ;;  %v239_v60 = vld [vmem:[#allocation2 + $0x1c0] sm:$0xff]  ;;  %v238_v61 = vld [vmem:[#allocation2 + $0x1b8] sm:$0xff]  ;;  %v237_v62 = vld [vmem:[#allocation2 + $0x1b0] sm:$0xff] }
  0x23   :  { %174 = vmatprep.subr.mxu1 %v124_v26  ;;  %311 = vmatpush1.msra.mxu0 %v251_v48  ;;  %v236_v63 = vld [vmem:[#allocation2 + $0x1a8] sm:$0xff]  ;;  %v235_v1 = vld [vmem:[#allocation2 + $0x1a0] sm:$0xff]  ;;  %v234_v2 = vld [vmem:[#allocation2 + $0x198] sm:$0xff] }
  0x24   :  { %175 = vmatpush1.msra.mxu1 %v123_v27  ;;  %312 = vmatprep.subr.mxu0 %v250_v49  ;;  %v233_v3 = vld [vmem:[#allocation2 + $0x190] sm:$0xff]  ;;  %v232_v4 = vld [vmem:[#allocation2 + $0x188] sm:$0xff]  ;;  %v231_v5 = vld [vmem:[#allocation2 + $0x180] sm:$0xff] }
  0x25   :  { %176 = vmatprep.subr.mxu1 %v122_v28  ;;  %313 = vmatpush1.msra.mxu0 %v249_v50  ;;  %v230_v6 = vld [vmem:[#allocation2 + $0x178] sm:$0xff]  ;;  %v229_v7 = vld [vmem:[#allocation2 + $0x170] sm:$0xff]  ;;  %v228_v8 = vld [vmem:[#allocation2 + $0x168] sm:$0xff] }
  0x26   :  { %177 = vmatpush1.msra.mxu1 %v121_v29  ;;  %314 = vmatprep.subr.mxu0 %v248_v51  ;;  %v227_v9 = vld [vmem:[#allocation2 + $0x160] sm:$0xff]  ;;  %v290_v10 = vld [vmem:[#allocation2 + $0x358] sm:$0xff]  ;;  %v289_v11 = vld [vmem:[#allocation2 + $0x350] sm:$0xff] }
  0x27   :  { %178 = vmatprep.subr.mxu1 %v120_v30  ;;  %315 = vmatpush1.msra.mxu0 %v247_v52  ;;  %v288_v12 = vld [vmem:[#allocation2 + $0x348] sm:$0xff]  ;;  %v287_v13 = vld [vmem:[#allocation2 + $0x340] sm:$0xff]  ;;  %v286_v14 = vld [vmem:[#allocation2 + $0x338] sm:$0xff] }
  0x28   :  { %179 = vmatpush1.msra.mxu1 %v119_v31  ;;  %316 = vmatprep.subr.mxu0 %v246_v53  ;;  %v285_v15 = vld [vmem:[#allocation2 + $0x330] sm:$0xff]  ;;  %v284_v16 = vld [vmem:[#allocation2 + $0x328] sm:$0xff]  ;;  %v283_v17 = vld [vmem:[#allocation2 + $0x320] sm:$0xff] }
  0x29   :  { %180 = vmatprep.subr.mxu1 %v118_v32  ;;  %317 = vmatpush1.msra.mxu0 %v245_v54  ;;  %v282_v18 = vld [vmem:[#allocation2 + $0x318] sm:$0xff]  ;;  %v281_v19 = vld [vmem:[#allocation2 + $0x310] sm:$0xff]  ;;  %v280_v20 = vld [vmem:[#allocation2 + $0x308] sm:$0xff] }
  0x2a   :  { %181 = vmatpush1.msra.mxu1 %v117_v33  ;;  %318 = vmatprep.subr.mxu0 %v244_v55  ;;  %v279_v21 = vld [vmem:[#allocation2 + $0x300] sm:$0xff]  ;;  %v278_v22 = vld [vmem:[#allocation2 + $0x2f8] sm:$0xff]  ;;  %v277_v23 = vld [vmem:[#allocation2 + $0x2f0] sm:$0xff] }
  0x2b   :  { %182 = vmatprep.subr.mxu1 %v116_v34  ;;  %319 = vmatpush1.msra.mxu0 %v243_v56  ;;  %v276_v24 = vld [vmem:[#allocation2 + $0x2e8] sm:$0xff]  ;;  %v275_v25 = vld [vmem:[#allocation2 + $0x2e0] sm:$0xff]  ;;  %v274_v26 = vld [vmem:[#allocation2 + $0x2d8] sm:$0xff] }
  0x2c   :  { %183 = vmatpush1.msra.mxu1 %v115_v35  ;;  %320 = vmatprep.subr.mxu0 %v242_v57  ;;  %v273_v27 = vld [vmem:[#allocation2 + $0x2d0] sm:$0xff]  ;;  %v272_v28 = vld [vmem:[#allocation2 + $0x2c8] sm:$0xff]  ;;  %v271_v29 = vld [vmem:[#allocation2 + $0x2c0] sm:$0xff] }
  0x2d   :  { %184 = vmatprep.subr.mxu1 %v114_v36  ;;  %321 = vmatpush1.msra.mxu0 %v241_v58  ;;  %v270_v30 = vld [vmem:[#allocation2 + $0x2b8] sm:$0xff]  ;;  %v269_v31 = vld [vmem:[#allocation2 + $0x2b0] sm:$0xff]  ;;  %v268_v32 = vld [vmem:[#allocation2 + $0x2a8] sm:$0xff] }
  0x2e   :  { %185 = vmatpush1.msra.mxu1 %v113_v37  ;;  %322 = vmatprep.subr.mxu0 %v240_v59  ;;  %v267_v33 = vld [vmem:[#allocation2 + $0x2a0] sm:$0xff]  ;;  %v266_v34 = vld [vmem:[#allocation2 + $0x298] sm:$0xff]  ;;  %v265_v35 = vld [vmem:[#allocation2 + $0x290] sm:$0xff] }
  0x2f   :  { %186 = vmatprep.subr.mxu1 %v112_v38  ;;  %323 = vmatpush1.msra.mxu0 %v239_v60  ;;  %v36_v36 = vld [vmem:[#allocation2 + $0x760] ss:$0 sm:$0xff]  ;;  %v402_v43 = vld [vmem:[#allocation2 + $0x438] sm:$0xff]  ;;  %v401_v44 = vld [vmem:[#allocation2 + $0x430] sm:$0xff] }
  0x30   :  { %187 = vmatpush1.msra.mxu1 %v111_v39  ;;  %324 = vmatprep.subr.mxu0 %v238_v61  ;;  %v405_v39 = vld [vmem:[#allocation2 + $0x450] sm:$0xff]  ;;  %v403_v42 = vld [vmem:[#allocation2 + $0x440] sm:$0xff]  ;;  %v400_v45 = vld [vmem:[#allocation2 + $0x428] sm:$0xff] }
  0x31   :  { %452 = vmatprep.subr.mxu1 %v406_v41  ;;  %325 = vmatpush1.msra.mxu0 %v237_v62  ;;  %v404_v41 = vld [vmem:[#allocation2 + $0x448] sm:$0xff]  ;;  %v399_v46 = vld [vmem:[#allocation2 + $0x420] sm:$0xff]  ;;  %v398_v47 = vld [vmem:[#allocation2 + $0x418] sm:$0xff] }
  0x32   :  { %326 = vmatprep.subr.mxu0 %v236_v63  ;;  %v397_v48 = vld [vmem:[#allocation2 + $0x410] sm:$0xff]  ;;  %v396_v49 = vld [vmem:[#allocation2 + $0x408] sm:$0xff]  ;;  %v395_v50 = vld [vmem:[#allocation2 + $0x400] sm:$0xff] }
  0x33   :  { %327 = vmatpush1.msra.mxu0 %v235_v1  ;;  %v394_v51 = vld [vmem:[#allocation2 + $0x3f8] sm:$0xff]  ;;  %v393_v52 = vld [vmem:[#allocation2 + $0x3f0] sm:$0xff]  ;;  %v392_v53 = vld [vmem:[#allocation2 + $0x3e8] sm:$0xff] }
  0x34   :  { %328 = vmatprep.subr.mxu0 %v234_v2  ;;  %v391_v54 = vld [vmem:[#allocation2 + $0x3e0] sm:$0xff]  ;;  %v390_v55 = vld [vmem:[#allocation2 + $0x3d8] sm:$0xff]  ;;  %v389_v56 = vld [vmem:[#allocation2 + $0x3d0] sm:$0xff] }
  0x35   :  { %329 = vmatpush1.msra.mxu0 %v233_v3  ;;  %v388_v57 = vld [vmem:[#allocation2 + $0x3c8] sm:$0xff]  ;;  %v387_v58 = vld [vmem:[#allocation2 + $0x3c0] sm:$0xff]  ;;  %v386_v59 = vld [vmem:[#allocation2 + $0x3b8] sm:$0xff] }
  0x36   :  { %330 = vmatprep.subr.mxu0 %v232_v4  ;;  %v385_v60 = vld [vmem:[#allocation2 + $0x3b0] sm:$0xff]  ;;  %v384_v61 = vld [vmem:[#allocation2 + $0x3a8] sm:$0xff]  ;;  %v383_v62 = vld [vmem:[#allocation2 + $0x3a0] sm:$0xff] }
  0x37   :  { %331 = vmatpush1.msra.mxu0 %v231_v5  ;;  %v382_v63 = vld [vmem:[#allocation2 + $0x398] sm:$0xff]  ;;  %v381_v1 = vld [vmem:[#allocation2 + $0x390] sm:$0xff]  ;;  %v380_v2 = vld [vmem:[#allocation2 + $0x388] sm:$0xff] }
  0x38   :  { %332 = vmatprep.subr.mxu0 %v230_v6  ;;  %v379_v3 = vld [vmem:[#allocation2 + $0x380] sm:$0xff]  ;;  %v378_v4 = vld [vmem:[#allocation2 + $0x378] sm:$0xff]  ;;  %v377_v5 = vld [vmem:[#allocation2 + $0x370] sm:$0xff] }
  0x39   :  { %333 = vmatpush1.msra.mxu0 %v229_v7  ;;  %v376_v6 = vld [vmem:[#allocation2 + $0x368] sm:$0xff]  ;;  %v375_v7 = vld [vmem:[#allocation2 + $0x360] sm:$0xff] }
  0x3a   :  { %334 = vmatprep.subr.mxu0 %v228_v8  ;;  %v438_v8 = vld [vmem:[#allocation2 + $0x558] sm:$0xff] }
  0x3b   :  { %335 = vmatpush1.msra.mxu0 %v227_v9  ;;  %v437_v9 = vld [vmem:[#allocation2 + $0x550] sm:$0xff] }
  0x3c   :  { %336 = vmatprep.subr.mxu0 %v290_v10  ;;  %v436_v10 = vld [vmem:[#allocation2 + $0x548] sm:$0xff] }
  0x3d   :  { %337 = vmatpush2.msra.mxu0 %v289_v11  ;;  %v435_v11 = vld [vmem:[#allocation2 + $0x540] sm:$0xff] }
  0x3e   :  { %338 = vmatprep.subr.mxu0 %v288_v12  ;;  %v434_v12 = vld [vmem:[#allocation2 + $0x538] sm:$0xff] }
  0x3f   :  { %339 = vmatpush2.msra.mxu0 %v287_v13  ;;  %v433_v13 = vld [vmem:[#allocation2 + $0x530] sm:$0xff] }
  0x40   :  { %340 = vmatprep.subr.mxu0 %v286_v14  ;;  %v432_v14 = vld [vmem:[#allocation2 + $0x528] sm:$0xff] }
  0x41   :  { %341 = vmatpush2.msra.mxu0 %v285_v15  ;;  %v431_v15 = vld [vmem:[#allocation2 + $0x520] sm:$0xff] }
  0x42   :  { %342 = vmatprep.subr.mxu0 %v284_v16  ;;  %v430_v16 = vld [vmem:[#allocation2 + $0x518] sm:$0xff] }
  0x43   :  { %343 = vmatpush2.msra.mxu0 %v283_v17  ;;  %v429_v17 = vld [vmem:[#allocation2 + $0x510] sm:$0xff] }
  0x44   :  { %344 = vmatprep.subr.mxu0 %v282_v18  ;;  %v428_v18 = vld [vmem:[#allocation2 + $0x508] sm:$0xff] }
  0x45   :  { %345 = vmatpush2.msra.mxu0 %v281_v19  ;;  %v427_v19 = vld [vmem:[#allocation2 + $0x500] sm:$0xff] }
  0x46   :  { %346 = vmatprep.subr.mxu0 %v280_v20  ;;  %v426_v20 = vld [vmem:[#allocation2 + $0x4f8] sm:$0xff] }
  0x47   :  { %347 = vmatpush2.msra.mxu0 %v279_v21  ;;  %v425_v21 = vld [vmem:[#allocation2 + $0x4f0] sm:$0xff] }
  0x48   :  { %348 = vmatprep.subr.mxu0 %v278_v22  ;;  %v424_v22 = vld [vmem:[#allocation2 + $0x4e8] sm:$0xff] }
  0x49   :  { %349 = vmatpush2.msra.mxu0 %v277_v23  ;;  %v423_v23 = vld [vmem:[#allocation2 + $0x4e0] sm:$0xff] }
  0x4a   :  { %350 = vmatprep.subr.mxu0 %v276_v24  ;;  %v422_v24 = vld [vmem:[#allocation2 + $0x4d8] sm:$0xff] }
  0x4b   :  { %351 = vmatpush2.msra.mxu0 %v275_v25  ;;  %v421_v25 = vld [vmem:[#allocation2 + $0x4d0] sm:$0xff] }
  0x4c   :  { %352 = vmatprep.subr.mxu0 %v274_v26  ;;  %v420_v26 = vld [vmem:[#allocation2 + $0x4c8] sm:$0xff] }
  0x4d   :  { %353 = vmatpush2.msra.mxu0 %v273_v27  ;;  %v419_v27 = vld [vmem:[#allocation2 + $0x4c0] sm:$0xff] }
  0x4e   :  { %354 = vmatprep.subr.mxu0 %v272_v28  ;;  %v418_v28 = vld [vmem:[#allocation2 + $0x4b8] sm:$0xff] }
  0x4f   :  { %355 = vmatpush2.msra.mxu0 %v271_v29  ;;  %v417_v29 = vld [vmem:[#allocation2 + $0x4b0] sm:$0xff] }
  0x50   :  { %356 = vmatprep.subr.mxu0 %v270_v30  ;;  %v416_v30 = vld [vmem:[#allocation2 + $0x4a8] sm:$0xff] }
  0x51   :  { %357 = vmatpush2.msra.mxu0 %v269_v31  ;;  %v415_v31 = vld [vmem:[#allocation2 + $0x4a0] sm:$0xff] }
  0x52   :  { %358 = vmatprep.subr.mxu0 %v268_v32  ;;  %v414_v32 = vld [vmem:[#allocation2 + $0x498] sm:$0xff] }
  0x53   :  { %359 = vmatpush2.msra.mxu0 %v267_v33  ;;  %v413_v33 = vld [vmem:[#allocation2 + $0x490] sm:$0xff] }
  0x54   :  { %360 = vmatprep.subr.mxu0 %v266_v34  ;;  %v264_v34 = vld [vmem:[#allocation2 + $0x288] sm:$0xff] }
  0x55   :  { %361 = vmatpush2.msra.mxu0 %v265_v35  ;;  %v412_v35 = vld [vmem:[#allocation2 + $0x488] sm:$0xff] }
  0x56   :  { %362 = vmatprep.subr.mxu0 %v264_v34  ;;  %v580_v34 = vld [vmem:[#allocation2 + $0x718] sm:$0xff] }
  0xdb   :  { %v107_v37 = vpop.f32.mrf.mxu0 }
  0xdc   :  { %v108_v38 = vadd.f32 %v107_v37, %v36_v36  ;;  %v263_v36 = vld [vmem:[#allocation2 + $0x280] sm:$0xff] }
  0xdd   :  { %v1080_v40 = vpop.f32.mrf.mxu0  ;;  %v411_v37 = vld [vmem:[#allocation2 + $0x480] sm:$0xff]  ;;  %363 = vmatpush2.msra.mxu0 %v263_v36  ;;  %v578_v36 = vld [vmem:[#allocation2 + $0x708] sm:$0xff] }
  0xde   :  { %221 = vmatmul.mubr.f32.vlgmr.msra.gmra.mxu1 %v108_v38  ;;  %v262_v38 = vld [vmem:[#allocation2 + $0x278] sm:$0xff]  ;;  %v261_v40 = vld [vmem:[#allocation2 + $0x270] sm:$0xff] }
  0xdf   :  { %453 = vmatpush1.msra.mxu1 %v405_v39  ;;  %v410_v39 = vld [vmem:[#allocation2 + $0x478] sm:$0xff]  ;;  %364 = vmatprep.subr.mxu0 %v262_v38 }
  0xe0   :  { %454 = vmatprep.subr.mxu1 %v404_v41  ;;  %v409_v41 = vld [vmem:[#allocation2 + $0x470] sm:$0xff]  ;;  %365 = vmatpush2.msra.mxu0 %v261_v40  ;;  %v576_v38 = vld [vmem:[#allocation2 + $0x6f8] sm:$0xff]  ;;  %v574_v40 = vld [vmem:[#allocation2 + $0x6e8] sm:$0xff] }
  0xe1   :  { %455 = vmatpush1.msra.mxu1 %v403_v42  ;;  %v260_v42 = vld [vmem:[#allocation2 + $0x268] sm:$0xff] }
  0xe2   :  { %456 = vmatprep.subr.mxu1 %v402_v43  ;;  %v408_v43 = vld [vmem:[#allocation2 + $0x468] sm:$0xff]  ;;  %366 = vmatprep.subr.mxu0 %v260_v42  ;;  %v572_v42 = vld [vmem:[#allocation2 + $0x6d8] sm:$0xff] }
  0xe3   :  { %457 = vmatpush1.msra.mxu1 %v401_v44  ;;  %v259_v44 = vld [vmem:[#allocation2 + $0x260] sm:$0xff] }
  0xe4   :  { %458 = vmatprep.subr.mxu1 %v400_v45  ;;  %v407_v45 = vld [vmem:[#allocation2 + $0x460] sm:$0xff]  ;;  %367 = vmatpush2.msra.mxu0 %v259_v44  ;;  %v570_v44 = vld [vmem:[#allocation2 + $0x6c8] sm:$0xff] }
  0xe5   :  { %459 = vmatpush1.msra.mxu1 %v399_v46  ;;  %v556_v46 = vld [vmem:[#allocation2 + $0x658] sm:$0xff] }
  0xe6   :  { %460 = vmatprep.subr.mxu1 %v398_v47  ;;  %602 = vmatprep.subr.mxu0 %v556_v46  ;;  %v146_v47 = vlaneseq  ;;  %v568_v46 = vld [vmem:[#allocation2 + $0x6b8] sm:$0xff] }
  0xe7   :  { %461 = vmatpush1.msra.mxu1 %v397_v48 }
  0xe8   :  { %462 = vmatprep.subr.mxu1 %v396_v49  ;;  %v147_v48 = vshrl.u32 %v146_v47, 7  ;;  %v567_v47 = vld [vmem:[#allocation2 + $0x6b0] sm:$0xff] }
  0xe9   :  { %463 = vmatpush1.msra.mxu1 %v395_v50 }
  0xea   :  { %464 = vmatprep.subr.mxu1 %v394_v51  ;;  %v1179_v49 = vsub.s32 1, %v147_v48  ;;  %v1181_v50 = vsub.s32 0, %v147_v48  ;;  %v144_v51 = vld [vmem:[#allocation2 + $0x770] ss:$8 sm:$0x3]  ;;  %v566_v48 = vld [vmem:[#allocation2 + $0x6a8] sm:$0xff] }
  0xeb   :  { %465 = vmatpush1.msra.mxu1 %v393_v52 }
  0xec   :  { %466 = vmatprep.subr.mxu1 %v392_v53  ;;  %v153_v52 = vrot.slane %v144_v51, %v1179_v49  ;;  %v149_v53 = vrot.slane %v144_v51, %v1181_v50  ;;  %v565_v51 = vld [vmem:[#allocation2 + $0x6a0] sm:$0xff] }
  0xed   :  { %467 = vmatpush1.msra.mxu1 %v391_v54 }
  0xee   :  { %468 = vmatprep.subr.mxu1 %v390_v55 }
  0xef   :  { %469 = vmatpush1.msra.mxu1 %v389_v56 }
  0xf0   :  { %470 = vmatprep.subr.mxu1 %v388_v57 }
  0xf1   :  { %471 = vmatpush1.msra.mxu1 %v387_v58  ;;  %v555_v58 = vld [vmem:[#allocation2 + $0x650] sm:$0xff] }
  0xf2   :  { %472 = vmatprep.subr.mxu1 %v386_v59  ;;  %v554_v59 = vld [vmem:[#allocation2 + $0x648] sm:$0xff] }
  0xf3   :  { %473 = vmatpush1.msra.mxu1 %v385_v60  ;;  %v553_v60 = vld [vmem:[#allocation2 + $0x640] sm:$0xff] }
  0xf4   :  { %474 = vmatprep.subr.mxu1 %v384_v61  ;;  %v552_v61 = vld [vmem:[#allocation2 + $0x638] sm:$0xff] }
  0xf5   :  { %475 = vmatpush1.msra.mxu1 %v383_v62  ;;  %v551_v62 = vld [vmem:[#allocation2 + $0x630] sm:$0xff] }
  0xf6   :  { %476 = vmatprep.subr.mxu1 %v382_v63  ;;  %v550_v63 = vld [vmem:[#allocation2 + $0x628] sm:$0xff] }
  0xf7   :  { %477 = vmatpush1.msra.mxu1 %v381_v1  ;;  %v549_v1 = vld [vmem:[#allocation2 + $0x620] sm:$0xff] }
  0xf8   :  { %478 = vmatprep.subr.mxu1 %v380_v2  ;;  %v548_v2 = vld [vmem:[#allocation2 + $0x618] sm:$0xff] }
  0xf9   :  { %479 = vmatpush1.msra.mxu1 %v379_v3  ;;  %v547_v3 = vld [vmem:[#allocation2 + $0x610] sm:$0xff] }
  0xfa   :  { %480 = vmatprep.subr.mxu1 %v378_v4  ;;  %v546_v4 = vld [vmem:[#allocation2 + $0x608] sm:$0xff] }
  0xfb   :  { %481 = vmatpush1.msra.mxu1 %v377_v5  ;;  %v545_v5 = vld [vmem:[#allocation2 + $0x600] sm:$0xff] }
  0xfc   :  { %482 = vmatprep.subr.mxu1 %v376_v6  ;;  %v544_v6 = vld [vmem:[#allocation2 + $0x5f8] sm:$0xff] }
  0xfd   :  { %483 = vmatpush1.msra.mxu1 %v375_v7  ;;  %v543_v7 = vld [vmem:[#allocation2 + $0x5f0] sm:$0xff] }
  0xfe   :  { %484 = vmatprep.subr.mxu1 %v438_v8  ;;  %v542_v8 = vld [vmem:[#allocation2 + $0x5e8] sm:$0xff] }
  0xff   :  { %485 = vmatpush2.msra.mxu1 %v437_v9  ;;  %v541_v9 = vld [vmem:[#allocation2 + $0x5e0] sm:$0xff] }
 0x100   :  { %486 = vmatprep.subr.mxu1 %v436_v10  ;;  %v540_v10 = vld [vmem:[#allocation2 + $0x5d8] sm:$0xff] }
 0x101   :  { %487 = vmatpush2.msra.mxu1 %v435_v11  ;;  %v539_v11 = vld [vmem:[#allocation2 + $0x5d0] sm:$0xff] }
 0x102   :  { %488 = vmatprep.subr.mxu1 %v434_v12  ;;  %v538_v12 = vld [vmem:[#allocation2 + $0x5c8] sm:$0xff] }
 0x103   :  { %489 = vmatpush2.msra.mxu1 %v433_v13  ;;  %v537_v13 = vld [vmem:[#allocation2 + $0x5c0] sm:$0xff] }
 0x104   :  { %490 = vmatprep.subr.mxu1 %v432_v14  ;;  %v536_v14 = vld [vmem:[#allocation2 + $0x5b8] sm:$0xff] }
 0x105   :  { %491 = vmatpush2.msra.mxu1 %v431_v15  ;;  %v535_v15 = vld [vmem:[#allocation2 + $0x5b0] sm:$0xff] }
 0x106   :  { %492 = vmatprep.subr.mxu1 %v430_v16  ;;  %v534_v16 = vld [vmem:[#allocation2 + $0x5a8] sm:$0xff] }
 0x107   :  { %493 = vmatpush2.msra.mxu1 %v429_v17  ;;  %v533_v17 = vld [vmem:[#allocation2 + $0x5a0] sm:$0xff] }
 0x108   :  { %494 = vmatprep.subr.mxu1 %v428_v18  ;;  %v532_v18 = vld [vmem:[#allocation2 + $0x598] sm:$0xff] }
 0x109   :  { %495 = vmatpush2.msra.mxu1 %v427_v19  ;;  %v531_v19 = vld [vmem:[#allocation2 + $0x590] sm:$0xff] }
 0x10a   :  { %496 = vmatprep.subr.mxu1 %v426_v20  ;;  %v530_v20 = vld [vmem:[#allocation2 + $0x588] sm:$0xff] }
 0x10b   :  { %497 = vmatpush2.msra.mxu1 %v425_v21  ;;  %v529_v21 = vld [vmem:[#allocation2 + $0x580] sm:$0xff] }
 0x10c   :  { %498 = vmatprep.subr.mxu1 %v424_v22  ;;  %v528_v22 = vld [vmem:[#allocation2 + $0x578] sm:$0xff] }
 0x10d   :  { %499 = vmatpush2.msra.mxu1 %v423_v23  ;;  %v527_v23 = vld [vmem:[#allocation2 + $0x570] sm:$0xff] }
 0x10e   :  { %500 = vmatprep.subr.mxu1 %v422_v24  ;;  %v526_v24 = vld [vmem:[#allocation2 + $0x568] sm:$0xff] }
 0x10f   :  { %501 = vmatpush2.msra.mxu1 %v421_v25  ;;  %v525_v25 = vld [vmem:[#allocation2 + $0x560] sm:$0xff] }
 0x110   :  { %502 = vmatprep.subr.mxu1 %v420_v26  ;;  %v588_v26 = vld [vmem:[#allocation2 + $0x758] sm:$0xff] }
 0x111   :  { %503 = vmatpush2.msra.mxu1 %v419_v27  ;;  %v587_v27 = vld [vmem:[#allocation2 + $0x750] sm:$0xff] }
 0x112   :  { %504 = vmatprep.subr.mxu1 %v418_v28  ;;  %v586_v28 = vld [vmem:[#allocation2 + $0x748] sm:$0xff] }
 0x113   :  { %505 = vmatpush2.msra.mxu1 %v417_v29  ;;  %v585_v29 = vld [vmem:[#allocation2 + $0x740] sm:$0xff] }
 0x114   :  { %506 = vmatprep.subr.mxu1 %v416_v30  ;;  %v584_v30 = vld [vmem:[#allocation2 + $0x738] sm:$0xff] }
 0x115   :  { %507 = vmatpush2.msra.mxu1 %v415_v31  ;;  %v583_v31 = vld [vmem:[#allocation2 + $0x730] sm:$0xff] }
 0x116   :  { %508 = vmatprep.subr.mxu1 %v414_v32  ;;  %v582_v32 = vld [vmem:[#allocation2 + $0x728] sm:$0xff] }
 0x117   :  { %509 = vmatpush2.msra.mxu1 %v413_v33  ;;  %v581_v33 = vld [vmem:[#allocation2 + $0x720] sm:$0xff] }
 0x118   :  { %510 = vmatprep.subr.mxu1 %v412_v35  ;;  %v579_v35 = vld [vmem:[#allocation2 + $0x710] sm:$0xff] }
 0x119   :  { %511 = vmatpush2.msra.mxu1 %v411_v37  ;;  %v577_v37 = vld [vmem:[#allocation2 + $0x700] sm:$0xff] }
 0x11a   :  { %512 = vmatprep.subr.mxu1 %v410_v39  ;;  %v575_v39 = vld [vmem:[#allocation2 + $0x6f0] sm:$0xff] }
 0x11b   :  { %513 = vmatpush2.msra.mxu1 %v409_v41  ;;  %v573_v41 = vld [vmem:[#allocation2 + $0x6e0] sm:$0xff] }
 0x11c   :  { %514 = vmatprep.subr.mxu1 %v408_v43  ;;  %v571_v43 = vld [vmem:[#allocation2 + $0x6d0] sm:$0xff] }
 0x11d   :  { %515 = vmatpush2.msra.mxu1 %v407_v45  ;;  %v569_v45 = vld [vmem:[#allocation2 + $0x6c0] sm:$0xff] }
 0x19e   :  { %v222_v54 = vpop.f32.mrf.mxu1 }
 0x19f   :  { %v1187_v57 = vadd.f32 %v222_v54, %v149_v53  ;;  %v563_v53 = vld [vmem:[#allocation2 + $0x690] sm:$0xff]  ;;  %v562_v54 = vld [vmem:[#allocation2 + $0x688] sm:$0xff] }
 0x1a0   :  { %v224_v55 = vpop.f32.mrf.mxu1 }
 0x1a1   :  { %v1185_v56 = vadd.f32 %v224_v55, %v153_v52  ;;  %v564_v52 = vld [vmem:[#allocation2 + $0x698] sm:$0xff]  ;;  %v561_v55 = vld [vmem:[#allocation2 + $0x680] sm:$0xff] }
 0x1a3   :  { %368 = vmatprep.mubr.f32.mxu0 %v1185_v56  ;;  %516 = vmatprep.mubr.f32.mxu1 %v1185_v56 }
 0x1a4   :  { %369 = vmatmul.mubr.f32.vlgmr.msra.gmra.mxu0 %v1187_v57  ;;  %517 = vmatmul.mubr.f32.vlgmr.msra.gmra.mxu1 %v1187_v57 }
 0x1a5   :  { %603 = vmatpush1.msra.mxu0 %v555_v58  ;;  %v560_v58 = vld [vmem:[#allocation2 + $0x678] sm:$0xff] }
 0x1a6   :  { %604 = vmatprep.subr.mxu0 %v554_v59  ;;  %v559_v59 = vld [vmem:[#allocation2 + $0x670] sm:$0xff] }
 0x1a7   :  { %605 = vmatpush1.msra.mxu0 %v553_v60  ;;  %v558_v60 = vld [vmem:[#allocation2 + $0x668] sm:$0xff] }
 0x1a8   :  { %606 = vmatprep.subr.mxu0 %v552_v61  ;;  %v557_v61 = vld [vmem:[#allocation2 + $0x660] sm:$0xff] }
 0x1a9   :  { %607 = vmatpush1.msra.mxu0 %v551_v62  ;;  %v736_v62 = vld [vmem:[%s1421_s2 + $0x1f8] sm:$0xff] }
 0x1aa   :  { %608 = vmatprep.subr.mxu0 %v550_v63  ;;  %v720_v63 = vld [vmem:[%s1421_s2 + $0x178] sm:$0xff]  ;;  %993 = vmatprep.subr.mxu1 %v736_v62 }
 0x1ab   :  { %609 = vmatpush1.msra.mxu0 %v549_v1  ;;  %v735_v1 = vld [vmem:[%s1421_s2 + $0x1f0] sm:$0xff]  ;;  %994 = vmatpush3.msra.mxu1 %v720_v63  ;;  %v684_v62 = vld [vmem:[%s1421_s2 + $0x58] sm:$0xff] }
 0x1ac   :  { %610 = vmatprep.subr.mxu0 %v548_v2  ;;  %v719_v2 = vld [vmem:[%s1421_s2 + $0x170] sm:$0xff]  ;;  %995 = vmatprep.subr.mxu1 %v735_v1 }
 0x1ad   :  { %611 = vmatpush1.msra.mxu0 %v547_v3  ;;  %v734_v3 = vld [vmem:[%s1421_s2 + $0x1e8] sm:$0xff]  ;;  %996 = vmatpush3.msra.mxu1 %v719_v2  ;;  %v699_v63 = vld [vmem:[%s1421_s2 + $0xd0] sm:$0xff] }
 0x1ae   :  { %612 = vmatprep.subr.mxu0 %v546_v4  ;;  %v718_v4 = vld [vmem:[%s1421_s2 + $0x168] sm:$0xff]  ;;  %997 = vmatprep.subr.mxu1 %v734_v3  ;;  %v683_v1 = vld [vmem:[%s1421_s2 + $0x50] sm:$0xff] }
 0x1af   :  { %613 = vmatpush1.msra.mxu0 %v545_v5  ;;  %v733_v5 = vld [vmem:[%s1421_s2 + $0x1e0] sm:$0xff]  ;;  %998 = vmatpush3.msra.mxu1 %v718_v4  ;;  %v698_v2 = vld [vmem:[%s1421_s2 + $0xc8] sm:$0xff] }
 0x1b0   :  { %614 = vmatprep.subr.mxu0 %v544_v6  ;;  %v717_v6 = vld [vmem:[%s1421_s2 + $0x160] sm:$0xff]  ;;  %999 = vmatprep.subr.mxu1 %v733_v5  ;;  %v682_v3 = vld [vmem:[%s1421_s2 + $0x48] sm:$0xff] }
 0x1b1   :  { %615 = vmatpush1.msra.mxu0 %v543_v7  ;;  %v732_v7 = vld [vmem:[%s1421_s2 + $0x1d8] sm:$0xff]  ;;  %1000 = vmatpush3.msra.mxu1 %v717_v6  ;;  %v697_v4 = vld [vmem:[%s1421_s2 + $0xc0] sm:$0xff] }
 0x1b2   :  { %616 = vmatprep.subr.mxu0 %v542_v8  ;;  %v716_v8 = vld [vmem:[%s1421_s2 + $0x158] sm:$0xff]  ;;  %1001 = vmatprep.subr.mxu1 %v732_v7  ;;  %v681_v5 = vld [vmem:[%s1421_s2 + $0x40] sm:$0xff] }
 0x1b3   :  { %617 = vmatpush1.msra.mxu0 %v541_v9  ;;  %v731_v9 = vld [vmem:[%s1421_s2 + $0x1d0] sm:$0xff]  ;;  %1002 = vmatpush3.msra.mxu1 %v716_v8  ;;  %v696_v6 = vld [vmem:[%s1421_s2 + $0xb8] sm:$0xff] }
 0x1b4   :  { %618 = vmatprep.subr.mxu0 %v540_v10  ;;  %v715_v10 = vld [vmem:[%s1421_s2 + $0x150] sm:$0xff]  ;;  %1003 = vmatprep.subr.mxu1 %v731_v9  ;;  %v680_v7 = vld [vmem:[%s1421_s2 + $0x38] sm:$0xff] }
 0x1b5   :  { %619 = vmatpush1.msra.mxu0 %v539_v11  ;;  %v730_v11 = vld [vmem:[%s1421_s2 + $0x1c8] sm:$0xff]  ;;  %1004 = vmatpush3.msra.mxu1 %v715_v10  ;;  %v695_v8 = vld [vmem:[%s1421_s2 + $0xb0] sm:$0xff] }
 0x1b6   :  { %620 = vmatprep.subr.mxu0 %v538_v12  ;;  %v714_v12 = vld [vmem:[%s1421_s2 + $0x148] sm:$0xff]  ;;  %1005 = vmatprep.subr.mxu1 %v730_v11  ;;  %v679_v9 = vld [vmem:[%s1421_s2 + $0x30] sm:$0xff] }
 0x1b7   :  { %621 = vmatpush1.msra.mxu0 %v537_v13  ;;  %v729_v13 = vld [vmem:[%s1421_s2 + $0x1c0] sm:$0xff]  ;;  %1006 = vmatpush3.msra.mxu1 %v714_v12  ;;  %v694_v10 = vld [vmem:[%s1421_s2 + $0xa8] sm:$0xff] }
 0x1b8   :  { %622 = vmatprep.subr.mxu0 %v536_v14  ;;  %v713_v14 = vld [vmem:[%s1421_s2 + $0x140] sm:$0xff]  ;;  %1007 = vmatprep.subr.mxu1 %v729_v13  ;;  %v678_v11 = vld [vmem:[%s1421_s2 + $0x28] sm:$0xff] }
 0x1b9   :  { %623 = vmatpush1.msra.mxu0 %v535_v15  ;;  %v728_v15 = vld [vmem:[%s1421_s2 + $0x1b8] sm:$0xff]  ;;  %1008 = vmatpush3.msra.mxu1 %v713_v14  ;;  %v693_v12 = vld [vmem:[%s1421_s2 + $0xa0] sm:$0xff] }
 0x1ba   :  { %624 = vmatprep.subr.mxu0 %v534_v16  ;;  %v712_v16 = vld [vmem:[%s1421_s2 + $0x138] sm:$0xff]  ;;  %1009 = vmatprep.subr.mxu1 %v728_v15  ;;  %v677_v13 = vld [vmem:[%s1421_s2 + $0x20] sm:$0xff] }
 0x1bb   :  { %625 = vmatpush1.msra.mxu0 %v533_v17  ;;  %v727_v17 = vld [vmem:[%s1421_s2 + $0x1b0] sm:$0xff]  ;;  %1010 = vmatpush3.msra.mxu1 %v712_v16  ;;  %v692_v14 = vld [vmem:[%s1421_s2 + $0x98] sm:$0xff] }
 0x1bc   :  { %626 = vmatprep.subr.mxu0 %v532_v18  ;;  %v711_v18 = vld [vmem:[%s1421_s2 + $0x130] sm:$0xff]  ;;  %1011 = vmatprep.subr.mxu1 %v727_v17  ;;  %v676_v15 = vld [vmem:[%s1421_s2 + $0x18] sm:$0xff] }
 0x1bd   :  { %627 = vmatpush1.msra.mxu0 %v531_v19  ;;  %v726_v19 = vld [vmem:[%s1421_s2 + $0x1a8] sm:$0xff]  ;;  %1012 = vmatpush3.msra.mxu1 %v711_v18  ;;  %v691_v16 = vld [vmem:[%s1421_s2 + $0x90] sm:$0xff] }
 0x1be   :  { %628 = vmatprep.subr.mxu0 %v530_v20  ;;  %v710_v20 = vld [vmem:[%s1421_s2 + $0x128] sm:$0xff]  ;;  %1013 = vmatprep.subr.mxu1 %v726_v19  ;;  %v675_v17 = vld [vmem:[%s1421_s2 + $0x10] sm:$0xff] }
 0x1bf   :  { %629 = vmatpush1.msra.mxu0 %v529_v21  ;;  %v725_v21 = vld [vmem:[%s1421_s2 + $0x1a0] sm:$0xff]  ;;  %1014 = vmatpush3.msra.mxu1 %v710_v20  ;;  %v690_v18 = vld [vmem:[%s1421_s2 + $0x88] sm:$0xff] }
 0x1c0   :  { %630 = vmatprep.subr.mxu0 %v528_v22  ;;  %v709_v22 = vld [vmem:[%s1421_s2 + $0x120] sm:$0xff]  ;;  %1015 = vmatprep.subr.mxu1 %v725_v21  ;;  %v674_v20 = vld [vmem:[%s1421_s2 + $0x8] sm:$0xff] }
 0x1c1   :  { %631 = vmatpush1.msra.mxu0 %v527_v23  ;;  %v724_v23 = vld [vmem:[%s1421_s2 + $0x198] sm:$0xff]  ;;  %1016 = vmatpush3.msra.mxu1 %v709_v22  ;;  %v689_v21 = vld [vmem:[%s1421_s2 + $0x80] sm:$0xff] }
 0x1c2   :  { %632 = vmatprep.subr.mxu0 %v526_v24  ;;  %v708_v24 = vld [vmem:[%s1421_s2 + $0x118] sm:$0xff]  ;;  %1017 = vmatprep.subr.mxu1 %v724_v23  ;;  %v673_v22 = vld [vmem:[%s1421_s2] sm:$0xff] }
 0x1c3   :  { %633 = vmatpush1.msra.mxu0 %v525_v25  ;;  %v723_v25 = vld [vmem:[%s1421_s2 + $0x190] sm:$0xff]  ;;  %1018 = vmatpush3.msra.mxu1 %v708_v24  ;;  %v884_v24 = vld [vmem:[%s1421_s2 + $0x208] sm:$0xff] }
 0x1c4   :  { %634 = vmatprep.subr.mxu0 %v588_v26  ;;  %1019 = vmatprep.subr.mxu1 %v723_v25  ;;  %v440_v26 = vld [vmem:[#allocation2 + $0x790] ss:$8 sm:$0x3] }
 0x1c5   :  { %635 = vmatpush2.msra.mxu0 %v587_v27  ;;  %v445_v27 = vrot.slane %v440_v26, %v1181_v50 }
 0x1c6   :  { %636 = vmatprep.subr.mxu0 %v586_v28  ;;  %v449_v28 = vrot.slane %v440_v26, %v1179_v49 }
 0x1c7   :  { %637 = vmatpush2.msra.mxu0 %v585_v29 }
 0x1c8   :  { %638 = vmatprep.subr.mxu0 %v584_v30 }
 0x1c9   :  { %639 = vmatpush2.msra.mxu0 %v583_v31 }
 0x1ca   :  { %640 = vmatprep.subr.mxu0 %v582_v32 }
 0x1cb   :  { %641 = vmatpush2.msra.mxu0 %v581_v33 }
 0x1cc   :  { %642 = vmatprep.subr.mxu0 %v580_v34 }
 0x1cd   :  { %643 = vmatpush2.msra.mxu0 %v579_v35  ;;  %v707_v35 = vld [vmem:[%s1421_s2 + $0x110] sm:$0xff] }
 0x1ce   :  { %644 = vmatprep.subr.mxu0 %v578_v36  ;;  %1020 = vmatpush3.msra.mxu1 %v707_v35  ;;  %v722_v36 = vld [vmem:[%s1421_s2 + $0x188] sm:$0xff] }
 0x1cf   :  { %645 = vmatpush2.msra.mxu0 %v577_v37  ;;  %1021 = vmatprep.subr.mxu1 %v722_v36  ;;  %v705_v37 = vld [vmem:[%s1421_s2 + $0x100] sm:$0xff] }
 0x1d0   :  { %646 = vmatprep.subr.mxu0 %v576_v38  ;;  %v704_v38 = vld [vmem:[%s1421_s2 + $0xf8] sm:$0xff] }
 0x1d1   :  { %647 = vmatpush2.msra.mxu0 %v575_v39 }
 0x1d2   :  { %648 = vmatprep.subr.mxu0 %v574_v40  ;;  %v590_v40 = vld [vmem:[#allocation2 + $0x7a0] ss:$8 sm:$0x3] }
 0x1d3   :  { %649 = vmatpush2.msra.mxu0 %v573_v41 }
 0x1d4   :  { %650 = vmatprep.subr.mxu0 %v572_v42  ;;  %v599_v42 = vrot.slane %v590_v40, %v1179_v49 }
 0x1d5   :  { %651 = vmatpush2.msra.mxu0 %v571_v43  ;;  %v1302_v43 = vld [vmem:[#allocation2 + $0x780] ss:$8 sm:$0x3] }
 0x1d6   :  { %652 = vmatprep.subr.mxu0 %v570_v44  ;;  %v595_v44 = vrot.slane %v590_v40, %v1181_v50  ;;  %v297_v19 = vrot.slane %v1302_v43, %v1181_v50  ;;  %v885_v50 = vld [vmem:[%s1421_s2 + $0x210] sm:$0xff] }
 0x1d7   :  { %653 = vmatpush2.msra.mxu0 %v569_v45 }
 0x1d8   :  { %654 = vmatprep.subr.mxu0 %v568_v46  ;;  %v301_v46 = vrot.slane %v1302_v43, %v1179_v49  ;;  %v702_v49 = vld [vmem:[%s1421_s2 + $0xe8] sm:$0xff] }
 0x1d9   :  { %655 = vmatpush2.msra.mxu0 %v567_v47 }
 0x1da   :  { %656 = vmatprep.subr.mxu0 %v566_v48 }
 0x1db   :  { %657 = vmatpush2.msra.mxu0 %v565_v51 }
 0x1dc   :  { %658 = vmatprep.subr.mxu0 %v564_v52  ;;  %v688_v52 = vld [vmem:[%s1421_s2 + $0x78] sm:$0xff] }
 0x1dd   :  { %659 = vmatpush2.msra.mxu0 %v563_v53 }
 0x1de   :  { %660 = vmatprep.subr.mxu0 %v562_v54  ;;  %v703_v54 = vld [vmem:[%s1421_s2 + $0xf0] sm:$0xff] }
 0x1df   :  { %661 = vmatpush2.msra.mxu0 %v561_v55  ;;  %v687_v55 = vld [vmem:[%s1421_s2 + $0x70] sm:$0xff] }
 0x1e0   :  { %662 = vmatprep.subr.mxu0 %v560_v58  ;;  %v686_v58 = vld [vmem:[%s1421_s2 + $0x68] sm:$0xff] }
 0x1e1   :  { %663 = vmatpush2.msra.mxu0 %v559_v59  ;;  %v701_v59 = vld [vmem:[%s1421_s2 + $0xe0] sm:$0xff] }
 0x1e2   :  { %664 = vmatprep.subr.mxu0 %v558_v60  ;;  %v685_v60 = vld [vmem:[%s1421_s2 + $0x60] sm:$0xff] }
 0x1e3   :  { %665 = vmatpush2.msra.mxu0 %v557_v61  ;;  %v700_v61 = vld [vmem:[%s1421_s2 + $0xd8] sm:$0xff] }
 0x1e4   :  { %1081 = vmatprep.subr.mxu0 %v1141_v0 }
 0x264   :  { %v518_v29 = vpop.f32.mrf.mxu1  ;;  %v1299_v39 = vpop.f32.mrf.mxu0 }
 0x265   :  { %v519_v30 = vadd.f32 %v518_v29, %v445_v27  ;;  %v371_v23 = vadd.f32 %v1299_v39, %v297_v19 }
 0x266   :  { %v520_v31 = vpop.f32.mrf.mxu1  ;;  %v372_v41 = vpop.f32.mrf.mxu0 }
 0x267   :  { %v521_v32 = vadd.f32 %v520_v31, %v449_v28  ;;  %v523_v34 = vadd.f32 %v519_v30, %v1187_v57  ;;  %v721_v57 = vld [vmem:[%s1421_s2 + $0x180] sm:$0xff]  ;;  %v373_v53 = vadd.f32 %v372_v41, %v301_v46 }
 0x268   :  { %v983_v31 = vld [vmem:[%s1421_s2 + $0x200] ss:$0 sm:$0xff] }
 0x269   :  { %v524_v33 = vadd.f32 %v521_v32, %v1185_v56  ;;  %v706_v56 = vld [vmem:[%s1421_s2 + $0x108] sm:$0xff] }
 0x26a   :  { %1022 = vmatpush3.msra.mxu1 %v706_v56 }
 0x26b   :  { %666 = vmatprep.mubr.f32.mxu0 %v524_v33  ;;  %1023 = vmatprep.subr.mxu1 %v721_v57 }
 0x26c   :  { %667 = vmatmul.mubr.f32.vlgmr.msra.gmra.mxu0 %v523_v34  ;;  %1024 = vmatpush3.msra.mxu1 %v705_v37 }
 0x26d   :  { %1085 = vmatprep.mubr.msk.f32.mxu0 %vm1142_vm0, %v1141_v0  ;;  %1028 = vmatprep.subr.mxu1 %v704_v38 }
 0x26e   :  { %1082 = vmatpush3.msra.mxu0 %v885_v50 }
 0x26f   :  { %1083 = vmatprep.subr.mxu0 %v1141_v0  ;;  %v984_v0 = vld [vmem:[%s1421_s2 + $0x218] ss:$0 sm:$0xff] }
 0x270   :  { %1084 = vmatpush3.msra.mxu0 %v884_v24 }
 0x32c   :  { %v668_v45 = vpop.f32.mrf.mxu0 }
 0x32d   :  { %v669_v51 = vadd.f32 %v668_v45, %v595_v44 }
 0x32e   :  { %v670_v47 = vpop.f32.mrf.mxu0 }
 0x32f   :  { %v671_v48 = vadd.f32 %v670_v47, %v599_v42 }
 0x331   :  { %801 = vmatprep.mubr.f32.mxu1 %v671_v48 }
 0x332   :  { %802 = vmatmul.mubr.f32.vlgmr.msra.gmra.mxu1 %v669_v51 }
 0x333   :  { %1029 = vmatpush3.msra.mxu1 %v688_v52  ;;  %871 = vmatprep.mubr.f32.mxu1 %v373_v53 }
 0x334   :  { %1030 = vmatprep.subr.mxu1 %v703_v54 }
 0x335   :  { %1031 = vmatpush3.msra.mxu1 %v687_v55 }
 0x336   :  { %1032 = vmatprep.subr.mxu1 %v702_v49 }
 0x337   :  { %1033 = vmatpush3.msra.mxu1 %v686_v58 }
 0x338   :  { %1034 = vmatprep.subr.mxu1 %v701_v59 }
 0x339   :  { %1035 = vmatpush3.msra.mxu1 %v685_v60 }
 0x33a   :  { %1036 = vmatprep.subr.mxu1 %v700_v61 }
 0x33b   :  { %1037 = vmatpush3.msra.mxu1 %v684_v62 }
 0x33c   :  { %1038 = vmatprep.subr.mxu1 %v699_v63 }
 0x33d   :  { %1039 = vmatpush3.msra.mxu1 %v683_v1 }
 0x33e   :  { %1040 = vmatprep.subr.mxu1 %v698_v2 }
 0x33f   :  { %1041 = vmatpush3.msra.mxu1 %v682_v3 }
 0x340   :  { %1042 = vmatprep.subr.mxu1 %v697_v4 }
 0x341   :  { %1043 = vmatpush3.msra.mxu1 %v681_v5 }
 0x342   :  { %1044 = vmatprep.subr.mxu1 %v696_v6 }
 0x343   :  { %1045 = vmatpush3.msra.mxu1 %v680_v7 }
 0x344   :  { %1046 = vmatprep.subr.mxu1 %v695_v8 }
 0x345   :  { %1047 = vmatpush3.msra.mxu1 %v679_v9 }
 0x346   :  { %1048 = vmatprep.subr.mxu1 %v694_v10 }
 0x347   :  { %1049 = vmatpush3.msra.mxu1 %v678_v11 }
 0x348   :  { %1050 = vmatprep.subr.mxu1 %v693_v12 }
 0x349   :  { %1051 = vmatpush3.msra.mxu1 %v677_v13 }
 0x34a   :  { %1052 = vmatprep.subr.mxu1 %v692_v14 }
 0x34b   :  { %1053 = vmatpush3.msra.mxu1 %v676_v15 }
 0x34c   :  { %1054 = vmatprep.subr.mxu1 %v691_v16 }
 0x34d   :  { %1055 = vmatpush3.msra.mxu1 %v675_v17 }
 0x34e   :  { %1056 = vmatprep.subr.mxu1 %v690_v18 }
 0x34f   :  { %1057 = vmatpush3.msra.mxu1 %v674_v20 }
 0x350   :  { %1058 = vmatprep.subr.mxu1 %v689_v21 }
 0x351   :  { %1059 = vmatpush3.msra.mxu1 %v673_v22 }
 0x352   :  { %872 = vmatmul.mubr.f32.vlgmr.msra.gmra.mxu1 %v371_v23 }
 0x3f2   :  { %v1025_v25 = vpop.f32.mrf.mxu1 }
 0x3f4   :  { %v1026_v26 = vpop.f32.mrf.mxu1 }
 0x3f5   :  { %v1027_v29 = vadd.f32 %v1026_v26, %v1025_v25 }
 0x412   :  { %v1060_v27 = vpop.f32.mrf.mxu1 }
 0x414   :  { %v1061_v28 = vpop.f32.mrf.mxu1 }
 0x415   :  { %v1062_v30 = vadd.f32 %v1061_v28, %v1060_v27 }
 0x417   :  { %v874_v32 = vadd.f32 %v1062_v30, %v1027_v29 }
 0x419   :  { %v882_v33 = vadd.f32 %v983_v31, %v874_v32 }
 0x41b   :  { %v883_v34 = vmax.f32 %v882_v33, 0.0 }
 0x41d   :  { %1086 = vmatmul.mubr.msk.f32.vlgmr.msra.gmra.mxu0 %vm891_vm2, %v883_v34 }
 0x4dd   :  { %v961_v35 = vpop.f32.mrf.mxu0 }
 0x4de   :  { %v962_v36 = vadd.f32 %v984_v0, %v961_v35 }
 0x4df   :  { %v1087_v56 = vpop.f32.mrf.mxu0 }
 0x4e0   :  { %966 = vst.msk [vmem:[#allocation5] sm:$0x3] %vm965_vm3, %v962_v36 }
 0x4e1   :  { %1125 = shalt.err (!%p1122_p9)
}
 0x4e2   :  { %976 = dma.vmem_to_hbm [thread:$0]  %s974_s13, 32, %s1422_s3, [#allocation4]  }
 0x4e3   :  { %1136 = dma.done.wait [#allocation4], 32  }
 0x4e4   :  { %1137 = vsyncadd [#allocation4], 4294967264 }
 0x4e5   :  { %980 = vsyncpa [#allocation3], 1 }
 0x4e6   :  { %981 = vsyncpa [#allocation4], 1 }

</bundles_post_ra>
